<compile_context>
chip_gen: v5e
topology: v5e:2x2
jax: 0.10.0
libtpu: 0.0.40
codegen_flags: <defaults>
</compile_context>

<pallas_src>
import math

import numpy as np
import jax
import jax.numpy as jnp
from jax.experimental import pallas as pl
from jax.experimental.pallas import tpu as pltpu

# -------------------- model hyper-parameters (small, synthetic) --------------
B = 2          # batch
S = 8          # sequence length
D = 32         # model size ("size" in EncoderLayer)
H = 4          # attention heads
D_FF = 64      # feed-forward hidden dim
EPS = 1e-6
NEG_BIG = 1e9

N = B * S             # stacked tokens
DK = D // H           # per-head dim
HN = H * N            # head-blocked score width
OUT_W = (S // 2) * D  # lane-dense output width per batch row (= 128)


# ------------------------------- Pallas kernel --------------------------------
def encoder_layer_kernel(x_ref, amask_ref, wqkv_ref, wo_ref, w1_ref, w2_ref,
                         vecs_ref, sel_ref, pool_sel_ref, lmat_ref, o_ref):
    f32 = jnp.float32
    bf16 = jnp.bfloat16

    x = x_ref[...]                      # (N, D)   f32, tokens stacked over batch
    add_mask = amask_ref[...]           # (N, HN)  f32, 0 = keep / -1e9 = masked
    sel = sel_ref[...]                  # (HN, D)  f32, head-block 0/1 selector
    pool_sel = pool_sel_ref[...]        # (N, OUT_W) f32, pooling 0/1 selector
    lmat = lmat_ref[...]                # (B, N)   f32, 0.5 batch-pool matrix

    vecs = vecs_ref[...]                # (8, 3D)  packed biases / LN params (f32)
    bqkv = vecs[0:1, :]                 # (1, 3D)
    b1 = vecs[1:2, :D_FF]
    bo = vecs[2:3, :D]
    b2 = vecs[3:4, :D]
    ln1g, ln1b = vecs[4:5, :D], vecs[5:6, :D]
    ln2g, ln2b = vecs[6:7, :D], vecs[7:8, :D]

    def layer_norm(v, g, b):
        mu = jnp.mean(v, axis=-1, keepdims=True)
        var = jnp.sum((v - mu) ** 2, axis=-1, keepdims=True) / (D - 1)  # unbiased
        return g * (v - mu) / (jnp.sqrt(var) + EPS) + b

    # ---------------- sublayer 0: multi-head self-attention -------------------
    xn = layer_norm(x, ln1g, ln1b)
    qkv = jnp.dot(xn.astype(bf16), wqkv_ref[...],
                  preferred_element_type=f32) + bqkv               # (N, 3D)
    q, k, v = qkv[:, :D], qkv[:, D:2 * D], qkv[:, 2 * D:]

    # Head-blocked K / V in (HN, D) layout via the precomputed selector
    # (row r = head r//N, column block c//DK; zero outside the head's lanes).
    kbig = jnp.concatenate([k] * H, axis=0) * sel                  # (HN, D)
    vbig = jnp.concatenate([v] * H, axis=0) * sel                  # (HN, D)

    # scores[:, h*N + j] = q_h . k_h[j] — contract the last dims (no k.T).
    scale = 1.0 / math.sqrt(DK)
    scores = jax.lax.dot_general(
        q.astype(bf16), kbig.astype(bf16),
        (((1,), (1,)), ((), ())), preferred_element_type=f32) * scale
    scores = scores + add_mask                                     # (N, HN)

    # Per-head-segment softmax; subtracting the per-row global max is safe
    # (shift invariance within each segment), masked entries -> exp(-1e9) = 0.
    rowmax = jnp.max(scores, axis=-1, keepdims=True)
    p = jnp.exp(scores - rowmax)                                   # (N, HN) f32

    # Fused value aggregation + per-head softmax denominator: one matmul gives
    # [numerator | per-head denominator already replicated across DK lanes].
    vd = jnp.concatenate([vbig, sel], axis=1).astype(bf16)         # (HN, 2D)
    num_den = jnp.dot(p.astype(bf16), vd, preferred_element_type=f32)  # (N, 2D)
    attn = num_den[:, :D] * pl.reciprocal(num_den[:, D:], approx=True)

    attn = jnp.dot(attn.astype(bf16), wo_ref[...],
                   preferred_element_type=f32) + bo
    x1 = x + attn                                                  # dropout = id

    # ---------------- sublayer 1: position-wise feed forward ------------------
    x1n = layer_norm(x1, ln2g, ln2b)
    hid = jnp.dot(x1n.astype(bf16), w1_ref[...],
                  preferred_element_type=f32) + b1
    hid = jnp.maximum(hid, 0.0)
    ff = jnp.dot(hid.astype(bf16), w2_ref[...],
                 preferred_element_type=f32) + b2
    x2 = x1 + ff                                                   # (N, D)

    # ---- SequenceCompressor: stride-2 mean pooling fused with flatten --------
    # out[b, i*D + d] = 0.5 * (x2[b*S + 2i, d] + x2[b*S + 2i + 1, d]) as one
    # lane replication + precomputed-selector multiply + (B,N)@(N,OUT_W) matmul,
    # so the output store is 128-lane dense.
    xw = jnp.concatenate([x2] * (S // 2), axis=1) * pool_sel       # (N, OUT_W)
    out = jnp.dot(lmat, xw, preferred_element_type=f32)            # (B, OUT_W)

    o_ref[...] = out.astype(o_ref.dtype)


# ------------------------------- wrapper ---------------------------------------
@jax.jit
def encoder_layer(x, mask, params):
    wqkv, wo, w1, w2, vecs, sel, pool_sel, lmat = params
    x2d = x.reshape(N, D).astype(jnp.float32)

    # Additive attention mask (N, HN), built once per call by XLA (hoisted out of
    # the kernel): cross-batch query/key pairs and masked keys get -1e9, rest 0.
    key_keep = mask.reshape(N).astype(jnp.float32)                 # stacked key mask
    qi = jnp.arange(N)[:, None]
    kj = jnp.arange(HN)[None, :] % N
    same_batch = (qi // S) == (kj // S)
    keep = jnp.where(same_batch, key_keep[kj], 0.0)
    add_mask = (keep - 1.0) * NEG_BIG                              # (N, HN)

    vmem = pl.BlockSpec(memory_space=pltpu.MemorySpace.VMEM)
    flat = pl.pallas_call(
        encoder_layer_kernel,
        out_shape=jax.ShapeDtypeStruct((B, OUT_W), jnp.float32),
        in_specs=[vmem] * 10,                                      # whole arrays in VMEM
        out_specs=vmem,                                            # no grid: single call
    )(x2d, add_mask, wqkv, wo, w1, w2, vecs, sel, pool_sel, lmat)
    return flat.reshape(B, S // 2, D)


def init_params(key):
    keys = jax.random.split(key, 6)
    scale_d = 1.0 / math.sqrt(D)
    scale_ff = 1.0 / math.sqrt(D_FF)
    wq = jax.random.normal(keys[0], (D, D), jnp.float32) * scale_d
    wk = jax.random.normal(keys[1], (D, D), jnp.float32) * scale_d
    wv = jax.random.normal(keys[2], (D, D), jnp.float32) * scale_d
    wo = jax.random.normal(keys[3], (D, D), jnp.float32) * scale_d
    w1 = jax.random.normal(keys[4], (D, D_FF), jnp.float32) * scale_d
    w2 = jax.random.normal(keys[5], (D_FF, D), jnp.float32) * scale_ff
    bq = jnp.zeros((1, D), jnp.float32)
    bk = jnp.zeros((1, D), jnp.float32)
    bv = jnp.zeros((1, D), jnp.float32)
    bo = jnp.zeros((1, D), jnp.float32)
    b1 = jnp.zeros((1, D_FF), jnp.float32)
    b2 = jnp.zeros((1, D), jnp.float32)
    ln1g = jnp.ones((1, D), jnp.float32)
    ln1b = jnp.zeros((1, D), jnp.float32)
    ln2g = jnp.ones((1, D), jnp.float32)
    ln2b = jnp.zeros((1, D), jnp.float32)
    return (wq, bq, wk, bk, wv, bv, wo, bo,
            ln1g, ln1b, w1, b1, w2, b2, ln2g, ln2b)


def pack_params(unpacked):
    """Pack the 16 raw parameters plus the hoisted structural constants into
    8 DMA-friendly tensors (done once, outside the kernel)."""
    (wq, bq, wk, bk, wv, bv, wo, bo,
     ln1g, ln1b, w1, b1, w2, b2, ln2g, ln2b) = unpacked

    # MXU operands are stored in bf16 (accumulation stays f32 in-kernel).
    wqkv = jnp.concatenate([wq, wk, wv], axis=1).astype(jnp.bfloat16)   # (D, 3D)
    wo_b = wo.astype(jnp.bfloat16)
    w1_b = w1.astype(jnp.bfloat16)
    w2_b = w2.astype(jnp.bfloat16)

    def pad(vrow):                                 # (1, w) -> (1, 3D)
        return jnp.pad(vrow, ((0, 0), (0, 3 * D - vrow.shape[1])))

    vecs = jnp.concatenate([
        jnp.concatenate([bq, bk, bv], axis=1),     # row 0: bqkv
        pad(b1),                                   # row 1
        pad(bo),                                   # row 2
        pad(b2),                                   # row 3
        pad(ln1g), pad(ln1b),                      # rows 4-5
        pad(ln2g), pad(ln2b),                      # rows 6-7
    ], axis=0)                                     # (8, 3D) f32

    # ---- hoisted structural constants (built on the host, never in-kernel) ---
    r = np.arange(HN)[:, None]
    c = np.arange(D)[None, :]
    sel = jnp.asarray(((r // N) == (c // DK)).astype(np.float32))          # (HN, D)

    pr = np.arange(N)[:, None]
    pc = np.arange(OUT_W)[None, :]
    pool_sel = jnp.asarray((((pr % S) // 2) == (pc // D)).astype(np.float32))  # (N, OUT_W)

    lr = np.arange(B)[:, None]
    lc = np.arange(N)[None, :]
    lmat = jnp.asarray(np.where(lr == (lc // S), 0.5, 0.0).astype(np.float32))  # (B, N)

    return (wqkv, wo_b, w1_b, w2_b, vecs, sel, pool_sel, lmat)


if __name__ == "__main__":
    key = jax.random.PRNGKey(0)
    kx, kp = jax.random.split(key)
    x = jax.random.normal(kx, (B, S, D), jnp.float32)
    mask = jnp.ones((B, 1, S), jnp.float32)   # 1 = attend, 0 = masked
    params = pack_params(init_params(kp))

    out = encoder_layer(x, mask, params)
    jax.block_until_ready(out)
    assert out.shape == (B, S // 2, D) and out.dtype == jnp.float32
    print("KERNEL_OK")
</pallas_src>

<mosaic_0001>
module attributes {stable_mosaic.version = 11 : i64} {
  func.func @encoder_layer_kernel(%arg0: memref<16x32xf32, #tpu.memory_space<vmem>>, %arg1: memref<16x64xf32, #tpu.memory_space<vmem>>, %arg2: memref<32x96xbf16, #tpu.memory_space<vmem>>, %arg3: memref<32x32xbf16, #tpu.memory_space<vmem>>, %arg4: memref<32x64xbf16, #tpu.memory_space<vmem>>, %arg5: memref<64x32xbf16, #tpu.memory_space<vmem>>, %arg6: memref<8x96xf32, #tpu.memory_space<vmem>>, %arg7: memref<64x32xf32, #tpu.memory_space<vmem>>, %arg8: memref<16x128xf32, #tpu.memory_space<vmem>>, %arg9: memref<2x16xf32, #tpu.memory_space<vmem>>, %arg10: memref<2x128xf32, #tpu.memory_space<vmem>>) attributes {dimension_semantics = [], scalar_prefetch = 0 : i64, scratch_operands = 0 : i64, tpu.core_type = #tpu.core_type<tc>} {
    %c0 = arith.constant 0 : index
    %c0_0 = arith.constant 0 : index
    %0 = vector.load %arg0[%c0, %c0_0] : memref<16x32xf32, #tpu.memory_space<vmem>>, vector<16x32xf32>
    %c0_1 = arith.constant 0 : index
    %c0_2 = arith.constant 0 : index
    %1 = vector.load %arg1[%c0_1, %c0_2] : memref<16x64xf32, #tpu.memory_space<vmem>>, vector<16x64xf32>
    %c0_3 = arith.constant 0 : index
    %c0_4 = arith.constant 0 : index
    %2 = vector.load %arg7[%c0_3, %c0_4] : memref<64x32xf32, #tpu.memory_space<vmem>>, vector<64x32xf32>
    %c0_5 = arith.constant 0 : index
    %c0_6 = arith.constant 0 : index
    %3 = vector.load %arg8[%c0_5, %c0_6] : memref<16x128xf32, #tpu.memory_space<vmem>>, vector<16x128xf32>
    %c0_7 = arith.constant 0 : index
    %c0_8 = arith.constant 0 : index
    %4 = vector.load %arg9[%c0_7, %c0_8] : memref<2x16xf32, #tpu.memory_space<vmem>>, vector<2x16xf32>
    %c0_9 = arith.constant 0 : index
    %c0_10 = arith.constant 0 : index
    %5 = vector.load %arg6[%c0_9, %c0_10] : memref<8x96xf32, #tpu.memory_space<vmem>>, vector<8x96xf32>
    %6 = vector.extract_strided_slice %5 {offsets = [0, 0], sizes = [1, 96], strides = [1, 1]} : vector<8x96xf32> to vector<1x96xf32>
    %7 = vector.extract_strided_slice %5 {offsets = [1, 0], sizes = [1, 64], strides = [1, 1]} : vector<8x96xf32> to vector<1x64xf32>
    %8 = vector.extract_strided_slice %5 {offsets = [2, 0], sizes = [1, 32], strides = [1, 1]} : vector<8x96xf32> to vector<1x32xf32>
    %9 = vector.extract_strided_slice %5 {offsets = [3, 0], sizes = [1, 32], strides = [1, 1]} : vector<8x96xf32> to vector<1x32xf32>
    %10 = vector.extract_strided_slice %5 {offsets = [4, 0], sizes = [1, 32], strides = [1, 1]} : vector<8x96xf32> to vector<1x32xf32>
    %11 = vector.extract_strided_slice %5 {offsets = [5, 0], sizes = [1, 32], strides = [1, 1]} : vector<8x96xf32> to vector<1x32xf32>
    %12 = vector.extract_strided_slice %5 {offsets = [6, 0], sizes = [1, 32], strides = [1, 1]} : vector<8x96xf32> to vector<1x32xf32>
    %13 = vector.extract_strided_slice %5 {offsets = [7, 0], sizes = [1, 32], strides = [1, 1]} : vector<8x96xf32> to vector<1x32xf32>
    %cst = arith.constant dense<0.000000e+00> : vector<16xf32>
    %14 = vector.multi_reduction <add>, %0, %cst [1] : vector<16x32xf32> to vector<16xf32>
    %15 = vector.shape_cast %14 : vector<16xf32> to vector<16x1xf32>
    %cst_11 = arith.constant 3.200000e+01 : f32
    %16 = vector.broadcast %cst_11 : f32 to vector<16x1xf32>
    %17 = arith.divf %15, %16 : vector<16x1xf32>
    %18 = vector.broadcast %17 : vector<16x1xf32> to vector<16x32xf32>
    %19 = arith.subf %0, %18 : vector<16x32xf32>
    %20 = arith.mulf %19, %19 : vector<16x32xf32>
    %cst_12 = arith.constant dense<0.000000e+00> : vector<16xf32>
    %21 = vector.multi_reduction <add>, %20, %cst_12 [1] : vector<16x32xf32> to vector<16xf32>
    %22 = vector.shape_cast %21 : vector<16xf32> to vector<16x1xf32>
    %cst_13 = arith.constant 3.100000e+01 : f32
    %23 = vector.broadcast %cst_13 : f32 to vector<16x1xf32>
    %24 = arith.divf %22, %23 : vector<16x1xf32>
    %25 = vector.broadcast %17 : vector<16x1xf32> to vector<16x32xf32>
    %26 = arith.subf %0, %25 : vector<16x32xf32>
    %27 = vector.broadcast %10 : vector<1x32xf32> to vector<16x32xf32>
    %28 = arith.mulf %27, %26 : vector<16x32xf32>
    %29 = math.sqrt %24 : vector<16x1xf32>
    %cst_14 = arith.constant 9.99999997E-7 : f32
    %30 = vector.broadcast %cst_14 : f32 to vector<16x1xf32>
    %31 = arith.addf %29, %30 : vector<16x1xf32>
    %32 = vector.broadcast %31 : vector<16x1xf32> to vector<16x32xf32>
    %33 = arith.divf %28, %32 : vector<16x32xf32>
    %34 = vector.broadcast %11 : vector<1x32xf32> to vector<16x32xf32>
    %35 = arith.addf %33, %34 : vector<16x32xf32>
    %36 = arith.truncf %35 : vector<16x32xf32> to vector<16x32xbf16>
    %c0_15 = arith.constant 0 : index
    %c0_16 = arith.constant 0 : index
    %37 = vector.load %arg2[%c0_15, %c0_16] : memref<32x96xbf16, #tpu.memory_space<vmem>>, vector<32x96xbf16>
    %cst_17 = arith.constant dense<0.000000e+00> : vector<16x96xf32>
    %38 = tpu.matmul %36, %37, %cst_17 {dimension_numbers = #tpu.dot_dimension_numbers<[1], [0], [0], [1], [0, 0, 1, 1], [], []>} : vector<16x32xbf16>, vector<32x96xbf16>, vector<16x96xf32> -> vector<16x96xf32>
    %39 = vector.broadcast %6 : vector<1x96xf32> to vector<16x96xf32>
    %40 = arith.addf %38, %39 : vector<16x96xf32>
    %41 = vector.extract_strided_slice %40 {offsets = [0, 0], sizes = [16, 32], strides = [1, 1]} : vector<16x96xf32> to vector<16x32xf32>
    %42 = vector.extract_strided_slice %40 {offsets = [0, 32], sizes = [16, 32], strides = [1, 1]} : vector<16x96xf32> to vector<16x32xf32>
    %43 = vector.extract_strided_slice %40 {offsets = [0, 64], sizes = [16, 32], strides = [1, 1]} : vector<16x96xf32> to vector<16x32xf32>
    %44 = tpu.concatenate %42, %42, %42, %42 in 0 : vector<16x32xf32>, vector<16x32xf32>, vector<16x32xf32>, vector<16x32xf32> -> vector<64x32xf32>
    %45 = arith.mulf %44, %2 : vector<64x32xf32>
    %46 = tpu.concatenate %43, %43, %43, %43 in 0 : vector<16x32xf32>, vector<16x32xf32>, vector<16x32xf32>, vector<16x32xf32> -> vector<64x32xf32>
    %47 = arith.mulf %46, %2 : vector<64x32xf32>
    %48 = arith.truncf %41 : vector<16x32xf32> to vector<16x32xbf16>
    %49 = arith.truncf %45 : vector<64x32xf32> to vector<64x32xbf16>
    %cst_18 = arith.constant dense<0.000000e+00> : vector<16x64xf32>
    %50 = tpu.matmul %48, %49, %cst_18 {dimension_numbers = #tpu.dot_dimension_numbers<[1], [1], [0], [0], [0, 0, 1, 0], [], []>} : vector<16x32xbf16>, vector<64x32xbf16>, vector<16x64xf32> -> vector<16x64xf32>
    %cst_19 = arith.constant 0.353553385 : f32
    %51 = vector.broadcast %cst_19 : f32 to vector<16x64xf32>
    %52 = arith.mulf %50, %51 : vector<16x64xf32>
    %53 = arith.addf %52, %1 : vector<16x64xf32>
    %cst_20 = arith.constant dense<0xFF800000> : vector<16xf32>
    %54 = vector.multi_reduction <maximumf>, %53, %cst_20 [1] : vector<16x64xf32> to vector<16xf32>
    %55 = vector.shape_cast %54 : vector<16xf32> to vector<16x1xf32>
    %56 = vector.broadcast %55 : vector<16x1xf32> to vector<16x64xf32>
    %57 = arith.subf %53, %56 : vector<16x64xf32>
    %58 = math.exp %57 : vector<16x64xf32>
    %59 = tpu.concatenate %47, %2 in 1 : vector<64x32xf32>, vector<64x32xf32> -> vector<64x64xf32>
    %60 = arith.truncf %59 : vector<64x64xf32> to vector<64x64xbf16>
    %61 = arith.truncf %58 : vector<16x64xf32> to vector<16x64xbf16>
    %cst_21 = arith.constant dense<0.000000e+00> : vector<16x64xf32>
    %62 = tpu.matmul %61, %60, %cst_21 {dimension_numbers = #tpu.dot_dimension_numbers<[1], [0], [0], [1], [0, 0, 1, 1], [], []>} : vector<16x64xbf16>, vector<64x64xbf16>, vector<16x64xf32> -> vector<16x64xf32>
    %63 = vector.extract_strided_slice %62 {offsets = [0, 0], sizes = [16, 32], strides = [1, 1]} : vector<16x64xf32> to vector<16x32xf32>
    %64 = vector.extract_strided_slice %62 {offsets = [0, 32], sizes = [16, 32], strides = [1, 1]} : vector<16x64xf32> to vector<16x32xf32>
    %65 = tpu.reciprocal %64 {approx = true} : vector<16x32xf32> -> vector<16x32xf32>
    %66 = arith.mulf %63, %65 : vector<16x32xf32>
    %67 = arith.truncf %66 : vector<16x32xf32> to vector<16x32xbf16>
    %c0_22 = arith.constant 0 : index
    %c0_23 = arith.constant 0 : index
    %68 = vector.load %arg3[%c0_22, %c0_23] : memref<32x32xbf16, #tpu.memory_space<vmem>>, vector<32x32xbf16>
    %cst_24 = arith.constant dense<0.000000e+00> : vector<16x32xf32>
    %69 = tpu.matmul %67, %68, %cst_24 {dimension_numbers = #tpu.dot_dimension_numbers<[1], [0], [0], [1], [0, 0, 1, 1], [], []>} : vector<16x32xbf16>, vector<32x32xbf16>, vector<16x32xf32> -> vector<16x32xf32>
    %70 = vector.broadcast %8 : vector<1x32xf32> to vector<16x32xf32>
    %71 = arith.addf %69, %70 : vector<16x32xf32>
    %72 = arith.addf %0, %71 : vector<16x32xf32>
    %cst_25 = arith.constant dense<0.000000e+00> : vector<16xf32>
    %73 = vector.multi_reduction <add>, %72, %cst_25 [1] : vector<16x32xf32> to vector<16xf32>
    %74 = vector.shape_cast %73 : vector<16xf32> to vector<16x1xf32>
    %cst_26 = arith.constant 3.200000e+01 : f32
    %75 = vector.broadcast %cst_26 : f32 to vector<16x1xf32>
    %76 = arith.divf %74, %75 : vector<16x1xf32>
    %77 = vector.broadcast %76 : vector<16x1xf32> to vector<16x32xf32>
    %78 = arith.subf %72, %77 : vector<16x32xf32>
    %79 = arith.mulf %78, %78 : vector<16x32xf32>
    %cst_27 = arith.constant dense<0.000000e+00> : vector<16xf32>
    %80 = vector.multi_reduction <add>, %79, %cst_27 [1] : vector<16x32xf32> to vector<16xf32>
    %81 = vector.shape_cast %80 : vector<16xf32> to vector<16x1xf32>
    %cst_28 = arith.constant 3.100000e+01 : f32
    %82 = vector.broadcast %cst_28 : f32 to vector<16x1xf32>
    %83 = arith.divf %81, %82 : vector<16x1xf32>
    %84 = vector.broadcast %76 : vector<16x1xf32> to vector<16x32xf32>
    %85 = arith.subf %72, %84 : vector<16x32xf32>
    %86 = vector.broadcast %12 : vector<1x32xf32> to vector<16x32xf32>
    %87 = arith.mulf %86, %85 : vector<16x32xf32>
    %88 = math.sqrt %83 : vector<16x1xf32>
    %cst_29 = arith.constant 9.99999997E-7 : f32
    %89 = vector.broadcast %cst_29 : f32 to vector<16x1xf32>
    %90 = arith.addf %88, %89 : vector<16x1xf32>
    %91 = vector.broadcast %90 : vector<16x1xf32> to vector<16x32xf32>
    %92 = arith.divf %87, %91 : vector<16x32xf32>
    %93 = vector.broadcast %13 : vector<1x32xf32> to vector<16x32xf32>
    %94 = arith.addf %92, %93 : vector<16x32xf32>
    %95 = arith.truncf %94 : vector<16x32xf32> to vector<16x32xbf16>
    %c0_30 = arith.constant 0 : index
    %c0_31 = arith.constant 0 : index
    %96 = vector.load %arg4[%c0_30, %c0_31] : memref<32x64xbf16, #tpu.memory_space<vmem>>, vector<32x64xbf16>
    %cst_32 = arith.constant dense<0.000000e+00> : vector<16x64xf32>
    %97 = tpu.matmul %95, %96, %cst_32 {dimension_numbers = #tpu.dot_dimension_numbers<[1], [0], [0], [1], [0, 0, 1, 1], [], []>} : vector<16x32xbf16>, vector<32x64xbf16>, vector<16x64xf32> -> vector<16x64xf32>
    %98 = vector.broadcast %7 : vector<1x64xf32> to vector<16x64xf32>
    %99 = arith.addf %97, %98 : vector<16x64xf32>
    %cst_33 = arith.constant 0.000000e+00 : f32
    %100 = vector.broadcast %cst_33 : f32 to vector<16x64xf32>
    %101 = arith.maximumf %99, %100 : vector<16x64xf32>
    %102 = arith.truncf %101 : vector<16x64xf32> to vector<16x64xbf16>
    %c0_34 = arith.constant 0 : index
    %c0_35 = arith.constant 0 : index
    %103 = vector.load %arg5[%c0_34, %c0_35] : memref<64x32xbf16, #tpu.memory_space<vmem>>, vector<64x32xbf16>
    %cst_36 = arith.constant dense<0.000000e+00> : vector<16x32xf32>
    %104 = tpu.matmul %102, %103, %cst_36 {dimension_numbers = #tpu.dot_dimension_numbers<[1], [0], [0], [1], [0, 0, 1, 1], [], []>} : vector<16x64xbf16>, vector<64x32xbf16>, vector<16x32xf32> -> vector<16x32xf32>
    %105 = vector.broadcast %9 : vector<1x32xf32> to vector<16x32xf32>
    %106 = arith.addf %104, %105 : vector<16x32xf32>
    %107 = arith.addf %72, %106 : vector<16x32xf32>
    %108 = tpu.concatenate %107, %107, %107, %107 in 1 : vector<16x32xf32>, vector<16x32xf32>, vector<16x32xf32>, vector<16x32xf32> -> vector<16x128xf32>
    %109 = arith.mulf %108, %3 : vector<16x128xf32>
    %cst_37 = arith.constant dense<0.000000e+00> : vector<2x128xf32>
    %110 = tpu.matmul %4, %109, %cst_37 {dimension_numbers = #tpu.dot_dimension_numbers<[1], [0], [0], [1], [0, 0, 1, 1], [], []>} : vector<2x16xf32>, vector<16x128xf32>, vector<2x128xf32> -> vector<2x128xf32>
    %c0_38 = arith.constant 0 : index
    %c0_39 = arith.constant 0 : index
    %111 = vector.load %arg10[%c0_38, %c0_39] : memref<2x128xf32, #tpu.memory_space<vmem>>, vector<2x128xf32>
    tpu.vector_store %arg10[%c0_38, %c0_39], %110 {strides = array<i32>} : memref<2x128xf32, #tpu.memory_space<vmem>>, vector<2x128xf32>,
    return
  }
}

</mosaic_0001>

<bundles_post_ra>
// kernel: encoder_layer.1
= control target key start
LH: loop header
LB: loop body
LE: loop exit
PB: predicated region body
PF: predicated region fallthrough
CT: control target
= control target key end

     0   :  { %vm52_vm0 = vcmask 261120   ;;  %v770_v4 = vmov 32.0   ;;  %v771_v21 = vmov 31.0   ;;  %s772_s23 = smov 32   ;;  %vm306_vm15 = vcmask 523264   ;;  %s1115_s0 = inlined_call_operand.vmem [shape: f32[16,32], index: 0, kind: input, shape index: {}]   ;;  %s1116_s2 = inlined_call_operand.vmem [shape: bf16[32,96], index: 2, kind: input, shape index: {}]   ;;  %s1117_s7 = inlined_call_operand.vmem [shape: f32[64,32], index: 7, kind: input, shape index: {}]   ;;  %s1118_s6 = inlined_call_operand.vmem [shape: f32[8,96], index: 6, kind: input, shape index: {}]   ;;  %s1119_s1 = inlined_call_operand.vmem [shape: f32[16,64], index: 1, kind: input, shape index: {}]   ;;  %s1120_s3 = inlined_call_operand.vmem [shape: bf16[32,32], index: 3, kind: input, shape index: {}]   ;;  %s1121_s4 = inlined_call_operand.vmem [shape: bf16[32,64], index: 4, kind: input, shape index: {}]   ;;  %s1122_s5 = inlined_call_operand.vmem [shape: bf16[64,32], index: 5, kind: input, shape index: {}]   ;;  %s1123_s8 = inlined_call_operand.vmem [shape: f32[16,128], index: 8, kind: input, shape index: {}]   ;;  %s1124_s9 = inlined_call_operand.vmem [shape: f32[2,16], index: 9, kind: input, shape index: {}]   ;;  %s1125_s10 = inlined_call_operand.vmem [shape: f32[2,128], index: 10, kind: output, shape index: {}]  }
   0x1   :  { %v833_v0 = vld [vmem:[%s1115_s0] sm:$0xff]  ;;  %v840_v2 = vld [vmem:[%s1115_s0 + $0x8] sm:$0xff]  ;;  %742 = vrcp.f32 %v770_v4  ;;  %v873_v50 = vld [vmem:[%s1117_s7 + $0x30] sm:$0xff]  ;;  %s774_s0 = smov 64  }
   0x2   :  { %v53_v1 = vsel %vm52_vm0, %v833_v0, 0.0  ;;  %v56_v3 = vsel %vm52_vm0, %v840_v2, 0.0  ;;  %744 = vrcp.f32 %v771_v21  ;;  %v708_v28 = vld [vmem:[%s1116_s2 + $0x8] sm:$0xff]  ;;  %v707_v30 = vld [vmem:[%s1116_s2] sm:$0xff]  ;;  %204 = vrot.lane.b32.xlu2 %v873_v50, %s772_s23  ;;  %v894_v58 = vld [vmem:[%s1117_s7 + $0x38] sm:$0xff] }
   0x3   :  { %54 = vadd.xlane.f32.xlu0 %v53_v1  ;;  %176 = vmatpush.bf16.msra.mxu0 %v708_v28  ;;  %v878_v51 = vld [vmem:[%s1117_s7 + $0x20] sm:$0xff]  ;;  %v887_v53 = vld [vmem:[%s1117_s7 + $0x28] sm:$0xff]  ;;  %v908_v4 = vld [vmem:[%s1117_s7 + $0x10] sm:$0xff] }
   0x4   :  { %v899_v59 = vld [vmem:[%s1117_s7 + $0x8] sm:$0xff] }
   0x7   :  { %v743_v5 = vpop.eup %742  ;;  %177 = vmatpush.bf16.msra.mxu0 %v707_v30 }
   0x8   :  { %v60_v6 = vmul.f32 32.0, %v743_v5  ;;  %vm64_vm1 = vweird.f32 %v743_v5  ;;  %v745_v22 = vpop.eup %744 }
   0x9   :  { %v79_v23 = vmul.f32 31.0, %v745_v22  ;;  %vm83_vm2 = vweird.f32 %v745_v22 }
   0xa   :  { %v61_v7 = vsub.f32 1.0, %v60_v6  ;;  %206 = vrot.lane.b32.xlu2 %v894_v58, %s772_s23  ;;  %v913_v6 = vld [vmem:[%s1118_s6] sm:$0xff] }
   0xb   :  { %57 = vadd.xlane.f32.xlu0 %v56_v3  ;;  %v80_v24 = vsub.f32 1.0, %v79_v23  ;;  %v43_v23 = vld [vmem:[%s1117_s7 + $0x18] sm:$0xff] }
   0xc   :  { %v62_v8 = vmul.f32 %v743_v5, %v61_v7 }
   0xd   :  { %v81_v25 = vmul.f32 %v745_v22, %v80_v24 }
   0xe   :  { %v63_v9 = vadd.f32 %v743_v5, %v62_v8 }
   0xf   :  { %v82_v26 = vadd.f32 %v745_v22, %v81_v25 }
  0x10   :  { %v844_v10 = vsel %vm64_vm1, %v743_v5, %v63_v9 }
  0x11   :  { %v860_v27 = vsel %vm83_vm2, %v745_v22, %v82_v26 }
  0x12   :  { %196 = vrot.lane.b32.xlu2 %v908_v4, %s772_s23 }
  0x1a   :  { %198 = vrot.lane.b32.xlu2 %v43_v23, %s772_s23 }
  0x1f   :  { %200 = vrot.lane.b32.xlu0 %v878_v51, %s772_s23 }
  0x27   :  { %194 = vrot.lane.b32.xlu0 %v899_v59, %s772_s23 }
  0x76   :  { %v55_v11 = vpop.xlane.xlu0 %54 }
  0x77   :  { %v66_v12 = vmul.f32 %v844_v10, %v55_v11  ;;  %v87_v11 = vperm.slane %v913_v6, 4 }
  0x79   :  { %v848_v13 = vsub.f32 %v833_v0, %v66_v12 }
  0x7b   :  { %v70_v14 = vmul.f32 %v848_v13, %v848_v13  ;;  %v88_v21 = vmul.f32 %v87_v11, %v848_v13 }
  0x7d   :  { %v72_v15 = vsel %vm52_vm0, %v70_v14, 0.0 }
  0x7e   :  { %73 = vadd.xlane.f32.xlu1 %v72_v15  ;;  %v58_v16 = vpop.xlane.xlu0 %57 }
  0x7f   :  { %v67_v17 = vmul.f32 %v844_v10, %v58_v16 }
  0x81   :  { %v855_v18 = vsub.f32 %v840_v2, %v67_v17 }
  0x83   :  { %v71_v19 = vmul.f32 %v855_v18, %v855_v18  ;;  %v89_v24 = vmul.f32 %v87_v11, %v855_v18  ;;  %v930_v18 = vpop.permute.xlu2 %204 }
  0x85   :  { %v75_v20 = vsel %vm52_vm0, %v71_v19, 0.0 }
  0x86   :  { %76 = vadd.xlane.f32.xlu1 %v75_v20 }
  0x9f   :  { %202 = vrot.lane.b32.xlu1 %v887_v53, %s772_s23 }
  0xf1   :  { %v74_v29 = vpop.xlane.xlu1 %73 }
  0xf2   :  { %v85_v31 = vmul.f32 %v860_v27, %v74_v29  ;;  %v146_v29 = vperm.slane %v913_v6, 5 }
  0xf4   :  { %746 = vrsqrt.f32 %v85_v31  ;;  %vm97_vm3 = vcmp.eq.f32.partialorder %v85_v31, inf  ;;  %v100_v44 = vand.u32 2147483648, %v85_v31  ;;  %vm99_vm4 = vcmp.eq.f32.partialorder %v85_v31, 0.0 }
  0xf9   :  { %v77_v32 = vpop.xlane.xlu1 %76 }
  0xfa   :  { %v747_v33 = vpop.eup %746  ;;  %v86_v34 = vmul.f32 %v860_v27, %v77_v32 }
  0xfb   :  { %v91_v35 = vmul.f32 %v747_v33, %v85_v31 }
  0xfc   :  { %748 = vrsqrt.f32 %v86_v34  ;;  %vm109_vm5 = vcmp.eq.f32.partialorder %v86_v34, inf  ;;  %v112_v55 = vand.u32 2147483648, %v86_v34  ;;  %vm111_vm6 = vcmp.eq.f32.partialorder %v86_v34, 0.0 }
  0xfd   :  { %v92_v36 = vmul.f32 %v747_v33, %v91_v35  ;;  %v932_v35 = vpop.permute.xlu2 %206 }
  0xff   :  { %v93_v37 = vmul.f32 0.5, %v92_v36 }
 0x101   :  { %v94_v38 = vsub.f32 1.5, %v93_v37 }
 0x102   :  { %v749_v39 = vpop.eup %748 }
 0x103   :  { %v95_v40 = vmul.f32 %v747_v33, %v94_v38  ;;  %v103_v41 = vmul.f32 %v749_v39, %v86_v34  ;;  %v154_v38 = vperm.slane %v913_v6, 0 }
 0x105   :  { %v96_v42 = vmul.f32 %v95_v40, %v85_v31  ;;  %v104_v43 = vmul.f32 %v749_v39, %v103_v41  ;;  %v934_v36 = vpop.permute.xlu2 %196 }
 0x107   :  { %v98_v45 = vsel %vm97_vm3, %v85_v31, %v96_v42  ;;  %v105_v46 = vmul.f32 0.5, %v104_v43 }
 0x108   :  { %v101_v47 = vsel %vm99_vm4, %v100_v44, %v98_v45 }
 0x109   :  { %v106_v48 = vsub.f32 1.5, %v105_v46  ;;  %v114_v49 = vadd.f32 1e-06, %v101_v47 }
 0x10b   :  { %v107_v52 = vmul.f32 %v749_v39, %v106_v48  ;;  %750 = vrcp.f32 %v114_v49  ;;  %v127_v7 = vand.u32 2147483648, %v114_v49  ;;  %vm121_vm8 = vweird.f32 %v114_v49  ;;  %v937_v39 = vpop.permute.xlu0 %200 }
 0x10c   :  { %v125_v8 = vand.u32 2147483647, %v114_v49 }
 0x10d   :  { %v108_v54 = vmul.f32 %v107_v52, %v86_v34  ;;  %v128_v15 = vor.u32 1.1754944e-38, %v127_v7  ;;  %v939_v40 = vpop.permute.xlu2 %198 }
 0x10e   :  { %vm126_vm10 = vcmp.eq.f32.partialorder %v125_v8, 8.507059e+37 }
 0x10f   :  { %v110_v56 = vsel %vm109_vm5, %v86_v34, %v108_v54  ;;  %v40_v34 = vld [vmem:[%s1117_s7] sm:$0xff]  ;;  %s773_s7 = smov 96  }
 0x110   :  { %v113_v57 = vsel %vm111_vm6, %v112_v55, %v110_v56  ;;  %192 = vrot.lane.b32.xlu2 %v40_v34, %s772_s23 }
 0x111   :  { %v751_v60 = vpop.eup %750  ;;  %v115_v61 = vadd.f32 1e-06, %v113_v57  ;;  %v943_v43 = vpop.permute.xlu1 %202 }
 0x112   :  { %v117_v62 = vmul.f32 %v751_v60, %v114_v49  ;;  %vm122_vm7 = vweird.f32 %v751_v60 }
 0x113   :  { %752 = vrcp.f32 %v115_v61  ;;  %vm123_vm9 = vmor %vm121_vm8, %vm122_vm7  ;;  %v142_v16 = vand.u32 2147483648, %v115_v61  ;;  %v140_v19 = vand.u32 2147483647, %v115_v61  ;;  %vm136_vm12 = vweird.f32 %v115_v61  ;;  %v959_v57 = vpop.permute.xlu0 %194 }
 0x114   :  { %v118_v63 = vsub.f32 1.0, %v117_v62 }
 0x115   :  { %v143_v25 = vor.u32 1.1754944e-38, %v142_v16  ;;  %vm141_vm14 = vcmp.eq.f32.partialorder %v140_v19, 8.507059e+37 }
 0x116   :  { %v119_v1 = vmul.f32 %v751_v60, %v118_v63 }
 0x118   :  { %v120_v3 = vadd.f32 %v751_v60, %v119_v1 }
 0x119   :  { %v753_v5 = vpop.eup %752 }
 0x11a   :  { %v132_v9 = vmul.f32 %v753_v5, %v115_v61  ;;  %v124_v12 = vsel %vm123_vm9, %v751_v60, %v120_v3  ;;  %vm137_vm11 = vweird.f32 %v753_v5 }
 0x11b   :  { %v129_v20 = vsel %vm126_vm10, %v128_v15, %v124_v12  ;;  %vm138_vm13 = vmor %vm136_vm12, %vm137_vm11 }
 0x11c   :  { %v133_v14 = vsub.f32 1.0, %v132_v9  ;;  %v130_v26 = vmul.f32 %v129_v20, %v88_v21 }
 0x11e   :  { %v134_v17 = vmul.f32 %v753_v5, %v133_v14  ;;  %v147_v13 = vadd.f32 %v146_v29, %v130_v26 }
 0x120   :  { %v135_v22 = vadd.f32 %v753_v5, %v134_v17 }
 0x122   :  { %v139_v28 = vsel %vm138_vm13, %v753_v5, %v135_v22  ;;  %vm626_vm13 = vcmask 785408  }
 0x123   :  { %v144_v30 = vsel %vm141_vm14, %v143_v25, %v139_v28 }
 0x124   :  { %v145_v31 = vmul.f32 %v144_v30, %v89_v24 }
 0x126   :  { %v148_v32 = vadd.f32 %v146_v29, %v145_v31 }
 0x128   :  { %v149_v33 = vpack.c.bf16 %v148_v32, %v147_v13 }
 0x12a   :  { %668 = vmatmul.msk.bf16.vlgmr.msra.gmra.mxu0 %vm52_vm0, %v149_v33 }
 0x16a   :  { %v963_v60 = vpop.permute.xlu2 %192 }
 0x1a7   :  { %v179_v37 = vpop.f32.mrf.mxu0 }
 0x1a8   :  { %v941_v41 = vadd.f32 %v179_v37, %v154_v38 }
 0x1aa   :  { %v220_v45 = vmul.f32 %v937_v39, %v941_v41  ;;  %v222_v46 = vmul.f32 %v930_v18, %v941_v41  ;;  %v218_v49 = vmul.f32 %v934_v36, %v941_v41  ;;  %v216_v62 = vmul.f32 %v963_v60, %v941_v41 }
 0x1af   :  { %v181_v42 = vpop.f32.mrf.mxu0 }
 0x1b0   :  { %v945_v44 = vadd.f32 %v181_v42, %v154_v38 }
 0x1b2   :  { %v221_v47 = vmul.f32 %v943_v43, %v945_v44  ;;  %v223_v48 = vmul.f32 %v932_v35, %v945_v44  ;;  %v219_v52 = vmul.f32 %v939_v40, %v945_v44  ;;  %v217_v61 = vmul.f32 %v959_v57, %v945_v44 }
 0x1b3   :  { %v256_v22 = vpack.c.bf16 %v945_v44, %v941_v41 }
 0x1b4   :  { %v259_v54 = vpack.c.bf16 %v221_v47, %v220_v45  ;;  %v260_v55 = vpack.c.bf16 %v223_v48, %v222_v46  ;;  %v258_v56 = vpack.c.bf16 %v219_v52, %v218_v49  ;;  %v257_v63 = vpack.c.bf16 %v217_v61, %v216_v62 }
 0x1b6   :  { %271 = vrot.lane.b32.xlu2 %v260_v55, %s773_s7  ;;  %267 = vrot.lane.b32.xlu0 %v258_v56, %s773_s7 }
 0x1b7   :  { %269 = vrot.lane.b32.xlu1 %v259_v54, %s773_s7 }
 0x1be   :  { %238 = vrot.lane.b32.xlu0 %v894_v58, %s774_s0  ;;  %265 = vrot.lane.b32.xlu2 %v257_v63, %s773_s7 }
 0x1bf   :  { %236 = vrot.lane.b32.xlu1 %v873_v50, %s774_s0 }
 0x1c6   :  { %228 = vrot.lane.b32.xlu0 %v908_v4, %s774_s0  ;;  %232 = vrot.lane.b32.xlu2 %v878_v51, %s774_s0 }
 0x1c7   :  { %234 = vrot.lane.b32.xlu1 %v887_v53, %s774_s0 }
 0x1ce   :  { %226 = vrot.lane.b32.xlu0 %v899_v59, %s774_s0  ;;  %230 = vrot.lane.b32.xlu2 %v43_v23, %s774_s0 }
 0x1cf   :  { %224 = vrot.lane.b32.xlu1 %v40_v34, %s774_s0 }
 0x210   :  { %v272_v58 = vpop.permute.xlu2 %271 }
 0x211   :  { %v286_v1 = vsel %vm52_vm0, %v272_v58, 0 }
 0x212   :  { %292 = vmatpush.bf16.xpose.msra.mxu1 %v286_v1 }
 0x218   :  { %v266_v5 = vpop.permute.xlu2 %265 }
 0x219   :  { %v277_v16 = vsel %vm52_vm0, %v266_v5, 0 }
 0x220   :  { %v233_v11 = vpop.permute.xlu2 %232 }
 0x221   :  { %v252_v14 = vmul.f32 %v233_v11, %v941_v41 }
 0x228   :  { %v268_v50 = vpop.permute.xlu0 %267  ;;  %v231_v20 = vpop.permute.xlu2 %230 }
 0x229   :  { %v270_v3 = vpop.permute.xlu1 %269  ;;  %v280_v8 = vsel %vm52_vm0, %v268_v50, 0  ;;  %v251_v23 = vmul.f32 %v231_v20, %v945_v44 }
 0x22a   :  { %v283_v4 = vsel %vm52_vm0, %v270_v3, 0 }
 0x22b   :  { %293 = vmatpush.bf16.xpose.msra.mxu1 %v283_v4 }
 0x230   :  { %v239_v51 = vpop.permute.xlu0 %238 }
 0x231   :  { %v237_v7 = vpop.permute.xlu1 %236  ;;  %v255_v53 = vmul.f32 %v239_v51, %v945_v44 }
 0x232   :  { %v254_v59 = vmul.f32 %v237_v7, %v941_v41 }
 0x233   :  { %294 = vmatpush.bf16.xpose.msra.mxu1 %v280_v8 }
 0x234   :  { %v722_v9 = vpack.i.bf16 %v255_v53, %v254_v59 }
 0x236   :  { %723 = vrot.lane.b32.xlu2 %v722_v9, %s774_s0 }
 0x238   :  { %v229_v17 = vpop.permute.xlu0 %228 }
 0x239   :  { %v235_v12 = vpop.permute.xlu1 %234  ;;  %v250_v21 = vmul.f32 %v229_v17, %v941_v41  ;;  %v710_v17 = vld [vmem:[%s1120_s3 + $0x8] sm:$0xff] }
 0x23a   :  { %v253_v15 = vmul.f32 %v235_v12, %v945_v44  ;;  %420 = vmatpush.bf16.msra.mxu3 %v710_v17  ;;  %v450_v17 = vperm.slane %v913_v6, 6 }
 0x23b   :  { %295 = vmatpush.bf16.xpose.msra.mxu1 %v277_v16  ;;  %v732_v24 = vpack.i.bf16 %v251_v23, %v250_v21 }
 0x23c   :  { %v727_v19 = vpack.i.bf16 %v253_v15, %v252_v14 }
 0x23e   :  { %728 = vrot.lane.b32.xlu2 %v727_v19, %s774_s0  ;;  %v709_v19 = vld [vmem:[%s1120_s3] sm:$0xff] }
 0x23f   :  { %421 = vmatpush.bf16.msra.mxu3 %v709_v19 }
 0x240   :  { %v227_v26 = vpop.permute.xlu0 %226 }
 0x241   :  { %v225_v25 = vpop.permute.xlu1 %224  ;;  %v249_v29 = vmul.f32 %v227_v26, %v945_v44 }
 0x242   :  { %669 = vmatmul.msk.bf16.vlgmr.msra.gmra.mxu1 %vm52_vm0, %v256_v22  ;;  %v248_v28 = vmul.f32 %v225_v25, %v941_v41  ;;  %v398_v25 = vperm.slane %v913_v6, 2 }
 0x244   :  { %v737_v30 = vpack.i.bf16 %v249_v29, %v248_v28 }
 0x246   :  { %733 = vrot.lane.b32.xlu2 %v732_v24, %s774_s0 }
 0x24e   :  { %738 = vrot.lane.b32.xlu2 %v737_v30, %s774_s0 }
 0x290   :  { %v724_v31 = vpop.permute.xlu2 %723 }
 0x291   :  { %v726_v13 = vunpack.i.h.bf16 %v724_v31  ;;  %v725_v32 = vunpack.i.l.bf16 %v724_v31 }
 0x293   :  { %v357_v33 = vsel %vm52_vm0, %v725_v32, %v930_v18  ;;  %v358_v34 = vsel %vm52_vm0, %v726_v13, %v932_v35 }
 0x294   :  { %v362_v37 = vpack.c.bf16 %v358_v34, %v357_v33 }
 0x296   :  { %371 = vmatpush.bf16.msra.mxu2 %v362_v37 }
 0x298   :  { %v729_v38 = vpop.permute.xlu2 %728 }
 0x299   :  { %v731_v42 = vunpack.i.h.bf16 %v729_v38  ;;  %v730_v45 = vunpack.i.l.bf16 %v729_v38 }
 0x29b   :  { %v355_v41 = vsel %vm52_vm0, %v730_v45, %v937_v39  ;;  %v356_v44 = vsel %vm52_vm0, %v731_v42, %v943_v43 }
 0x29c   :  { %v361_v46 = vpack.c.bf16 %v356_v44, %v355_v41 }
 0x29e   :  { %372 = vmatpush.bf16.msra.mxu2 %v361_v46 }
 0x2a0   :  { %v734_v47 = vpop.permute.xlu2 %733 }
 0x2a1   :  { %v736_v48 = vunpack.i.h.bf16 %v734_v47  ;;  %v735_v49 = vunpack.i.l.bf16 %v734_v47 }
 0x2a3   :  { %v353_v18 = vsel %vm52_vm0, %v735_v49, %v934_v36  ;;  %v354_v35 = vsel %vm52_vm0, %v736_v48, %v939_v40  ;;  %v38_v36 = vld [vmem:[%s1119_s1] sm:$0xff]  ;;  %v712_v49 = vld [vmem:[%s1121_s4 + $0x8] sm:$0xff] }
 0x2a4   :  { %v360_v52 = vpack.c.bf16 %v354_v35, %v353_v18  ;;  %539 = vmatpush.bf16.msrb.mxu0 %v712_v49 }
 0x2a6   :  { %373 = vmatpush.bf16.msra.mxu2 %v360_v52 }
 0x2a8   :  { %v739_v54 = vpop.permute.xlu2 %738 }
 0x2a9   :  { %v741_v55 = vunpack.i.h.bf16 %v739_v54  ;;  %v740_v56 = vunpack.i.l.bf16 %v739_v54 }
 0x2ab   :  { %v351_v39 = vsel %vm52_vm0, %v740_v56, %v963_v60  ;;  %v352_v43 = vsel %vm52_vm0, %v741_v55, %v959_v57  ;;  %v39_v60 = vld [vmem:[%s1119_s1 + $0x8] sm:$0xff] }
 0x2ac   :  { %v359_v61 = vpack.c.bf16 %v352_v43, %v351_v39 }
 0x2ae   :  { %374 = vmatpush.bf16.msra.mxu2 %v359_v61 }
 0x2bf   :  { %v297_v62 = vpop.f32.mrf.mxu1 }
 0x2c0   :  { %v302_v63 = vmul.f32 0.35355338, %v297_v62 }
 0x2c2   :  { %v304_v40 = vadd.f32 %v302_v63, %v38_v36 }
 0x2c4   :  { %v307_v58 = vsel %vm306_vm15, %v304_v40, -inf }
 0x2c5   :  { %308 = vmax.xlane.f32.xlu1 %v307_v58 }
 0x2c7   :  { %v299_v1 = vpop.f32.mrf.mxu1 }
 0x2c8   :  { %v303_v50 = vmul.f32 0.35355338, %v299_v1 }
 0x2ca   :  { %v305_v57 = vadd.f32 %v303_v50, %v39_v60 }
 0x2cc   :  { %v310_v3 = vsel %vm306_vm15, %v305_v57, -inf }
 0x2cd   :  { %311 = vmax.xlane.f32.xlu0 %v310_v3 }
 0x338   :  { %v309_v4 = vpop.xlane.xlu1 %308 }
 0x339   :  { %v313_v5 = vsub.f32 %v304_v40, %v309_v4 }
 0x33b   :  { %v315_v51 = vmul.f32 1.442695, %v313_v5 }
 0x33d   :  { %754 = vpow2.f32 %v315_v51 }
 0x340   :  { %v312_v7 = vpop.xlane.xlu0 %311 }
 0x341   :  { %v314_v53 = vsub.f32 %v305_v57, %v312_v7 }
 0x343   :  { %v317_v59 = vmul.f32 1.442695, %v314_v53  ;;  %v755_v8 = vpop.eup %754 }
 0x345   :  { %756 = vpow2.f32 %v317_v59 }
 0x34b   :  { %v757_v9 = vpop.eup %756 }
 0x34c   :  { %v363_v11 = vpack.c.bf16 %v757_v9, %v755_v8 }
 0x34e   :  { %670 = vmatmul.msk.bf16.vlgmr.msra.gmra.mxu2 %vm306_vm15, %v363_v11 }
 0x3d1   :  { %v376_v12 = vpop.f32.mrf.mxu2 }
 0x3d2   :  { %758 = vrcp.f32 %v376_v12 }
 0x3d8   :  { %v759_v14 = vpop.eup %758 }
 0x3d9   :  { %385 = vrot.lane.b32.xlu2 %v759_v14, %s773_s7  ;;  %v378_v15 = vpop.f32.mrf.mxu2 }
 0x3da   :  { %760 = vrcp.f32 %v378_v15 }
 0x3e0   :  { %v761_v16 = vpop.eup %760 }
 0x3e1   :  { %387 = vrot.lane.b32.xlu2 %v761_v16, %s773_s7 }
 0x433   :  { %v386_v20 = vpop.permute.xlu2 %385 }
 0x434   :  { %v391_v22 = vmul.f32 %v386_v20, %v376_v12 }
 0x43b   :  { %v388_v21 = vpop.permute.xlu2 %387 }
 0x43c   :  { %v392_v23 = vmul.f32 %v388_v21, %v378_v15 }
 0x43e   :  { %v393_v24 = vpack.c.bf16 %v392_v23, %v391_v22 }
 0x440   :  { %679 = vmatmul.msk.bf16.vlgmr.msra.gmra.mxu3 %vm52_vm0, %v393_v24 }
 0x4c3   :  { %v423_v26 = vpop.f32.mrf.mxu3 }
 0x4c4   :  { %v424_v28 = vadd.f32 %v423_v26, %v398_v25 }
 0x4c6   :  { %v1040_v29 = vadd.f32 %v424_v28, %v833_v0 }
 0x4c8   :  { %v430_v30 = vsel %vm52_vm0, %v1040_v29, 0.0 }
 0x4c9   :  { %431 = vadd.xlane.f32.xlu1 %v430_v30 }
 0x4cb   :  { %v425_v31 = vpop.f32.mrf.mxu3 }
 0x4cc   :  { %v426_v13 = vadd.f32 %v425_v31, %v398_v25 }
 0x4ce   :  { %v1045_v32 = vadd.f32 %v426_v13, %v840_v2 }
 0x4d0   :  { %v433_v33 = vsel %vm52_vm0, %v1045_v32, 0.0 }
 0x4d1   :  { %434 = vadd.xlane.f32.xlu0 %v433_v33 }
 0x53c   :  { %v432_v34 = vpop.xlane.xlu1 %431 }
 0x53d   :  { %v436_v37 = vmul.f32 %v432_v34, %v844_v10  ;;  %v509_v34 = vperm.slane %v913_v6, 7 }
 0x53f   :  { %v1051_v38 = vsub.f32 %v1040_v29, %v436_v37 }
 0x541   :  { %v440_v0 = vmul.f32 %v1051_v38, %v1051_v38  ;;  %v451_v26 = vmul.f32 %v450_v17, %v1051_v38  ;;  %v716_v38 = vld [vmem:[%s1122_s5 + $0x18] sm:$0xff] }
 0x542   :  { %590 = vmatpush.bf16.msrb.mxu3 %v716_v38 }
 0x543   :  { %v442_v42 = vsel %vm52_vm0, %v440_v0, 0.0 }
 0x544   :  { %v435_v45 = vpop.xlane.xlu0 %434  ;;  %443 = vadd.xlane.f32.xlu2 %v442_v42 }
 0x545   :  { %v437_v2 = vmul.f32 %v435_v45, %v844_v10  ;;  %v711_v10 = vld [vmem:[%s1121_s4] sm:$0xff] }
 0x546   :  { %540 = vmatpush.bf16.msrb.mxu0 %v711_v10 }
 0x547   :  { %v1058_v41 = vsub.f32 %v1045_v32, %v437_v2 }
 0x549   :  { %v441_v44 = vmul.f32 %v1058_v41, %v1058_v41  ;;  %v452_v30 = vmul.f32 %v450_v17, %v1058_v41  ;;  %v715_v41 = vld [vmem:[%s1122_s5 + $0x10] sm:$0xff] }
 0x54a   :  { %591 = vmatpush.bf16.msrb.mxu3 %v715_v41 }
 0x54b   :  { %v445_v46 = vsel %vm52_vm0, %v441_v44, 0.0  ;;  %v714_v44 = vld [vmem:[%s1122_s5 + $0x8] sm:$0xff] }
 0x54c   :  { %446 = vadd.xlane.f32.xlu1 %v445_v46  ;;  %v713_v46 = vld [vmem:[%s1122_s5] sm:$0xff] }
 0x54e   :  { %592 = vmatpush.bf16.msrb.mxu3 %v714_v44 }
 0x552   :  { %593 = vmatpush.bf16.msrb.mxu3 %v713_v46 }
 0x5b7   :  { %v444_v47 = vpop.xlane.xlu2 %443 }
 0x5b8   :  { %v448_v48 = vmul.f32 %v444_v47, %v860_v27 }
 0x5ba   :  { %762 = vrsqrt.f32 %v448_v48  ;;  %vm460_vm1 = vcmp.eq.f32.partialorder %v448_v48, inf  ;;  %v463_v40 = vand.u32 2147483648, %v448_v48  ;;  %vm462_vm2 = vcmp.eq.f32.partialorder %v448_v48, 0.0 }
 0x5bf   :  { %v447_v18 = vpop.xlane.xlu1 %446 }
 0x5c0   :  { %v763_v35 = vpop.eup %762  ;;  %v449_v52 = vmul.f32 %v447_v18, %v860_v27 }
 0x5c1   :  { %v454_v54 = vmul.f32 %v763_v35, %v448_v48 }
 0x5c2   :  { %764 = vrsqrt.f32 %v449_v52  ;;  %vm472_vm3 = vcmp.eq.f32.partialorder %v449_v52, inf  ;;  %v475_v4 = vand.u32 2147483648, %v449_v52  ;;  %vm474_vm4 = vcmp.eq.f32.partialorder %v449_v52, 0.0 }
 0x5c3   :  { %v455_v55 = vmul.f32 %v763_v35, %v454_v54 }
 0x5c5   :  { %v456_v56 = vmul.f32 0.5, %v455_v55  ;;  %v558_v55 = vperm.slane %v913_v6, 3 }
 0x5c7   :  { %v457_v39 = vsub.f32 1.5, %v456_v56 }
 0x5c8   :  { %v765_v43 = vpop.eup %764 }
 0x5c9   :  { %v458_v61 = vmul.f32 %v763_v35, %v457_v39  ;;  %v466_v62 = vmul.f32 %v765_v43, %v449_v52 }
 0x5cb   :  { %v459_v36 = vmul.f32 %v458_v61, %v448_v48  ;;  %v467_v63 = vmul.f32 %v765_v43, %v466_v62 }
 0x5cd   :  { %v461_v58 = vsel %vm460_vm1, %v448_v48, %v459_v36  ;;  %v468_v60 = vmul.f32 0.5, %v467_v63  ;;  %v517_v48 = vperm.slane %v913_v6, 1 }
 0x5ce   :  { %v464_v1 = vsel %vm462_vm2, %v463_v40, %v461_v58  ;;  %v49_v58 = vld [vmem:[%s1123_s8 + $0x8] sm:$0xff] }
 0x5cf   :  { %v477_v50 = vadd.f32 1e-06, %v464_v1  ;;  %v469_v57 = vsub.f32 1.5, %v468_v60 }
 0x5d1   :  { %766 = vrcp.f32 %v477_v50  ;;  %v470_v27 = vmul.f32 %v765_v43, %v469_v57  ;;  %v490_v14 = vand.u32 2147483648, %v477_v50  ;;  %vm484_vm6 = vweird.f32 %v477_v50  ;;  %v48_v57 = vld [vmem:[%s1123_s8] sm:$0xff] }
 0x5d2   :  { %v488_v15 = vand.u32 2147483647, %v477_v50 }
 0x5d3   :  { %v471_v3 = vmul.f32 %v470_v27, %v449_v52  ;;  %v491_v21 = vor.u32 1.1754944e-38, %v490_v14 }
 0x5d4   :  { %vm489_vm8 = vcmp.eq.f32.partialorder %v488_v15, 8.507059e+37 }
 0x5d5   :  { %v473_v5 = vsel %vm472_vm3, %v449_v52, %v471_v3 }
 0x5d6   :  { %v476_v51 = vsel %vm474_vm4, %v475_v4, %v473_v5 }
 0x5d7   :  { %v767_v7 = vpop.eup %766  ;;  %v478_v53 = vadd.f32 1e-06, %v476_v51 }
 0x5d8   :  { %v480_v59 = vmul.f32 %v767_v7, %v477_v50  ;;  %vm485_vm5 = vweird.f32 %v767_v7 }
 0x5d9   :  { %768 = vrcp.f32 %v478_v53  ;;  %vm486_vm7 = vmor %vm484_vm6, %vm485_vm5  ;;  %v505_v22 = vand.u32 2147483648, %v478_v53  ;;  %v503_v24 = vand.u32 2147483647, %v478_v53  ;;  %vm499_vm10 = vweird.f32 %v478_v53 }
 0x5da   :  { %v481_v8 = vsub.f32 1.0, %v480_v59 }
 0x5db   :  { %v506_v31 = vor.u32 1.1754944e-38, %v505_v22  ;;  %vm504_vm12 = vcmp.eq.f32.partialorder %v503_v24, 8.507059e+37 }
 0x5dc   :  { %v482_v9 = vmul.f32 %v767_v7, %v481_v8 }
 0x5de   :  { %v483_v11 = vadd.f32 %v767_v7, %v482_v9 }
 0x5df   :  { %v769_v12 = vpop.eup %768 }
 0x5e0   :  { %v495_v16 = vmul.f32 %v769_v12, %v478_v53  ;;  %v487_v19 = vsel %vm486_vm7, %v767_v7, %v483_v11  ;;  %vm500_vm9 = vweird.f32 %v769_v12  ;;  %v50_v53 = vld [vmem:[%s1124_s9] sm:$0x3] }
 0x5e1   :  { %v492_v25 = vsel %vm489_vm8, %v491_v21, %v487_v19  ;;  %vm501_vm11 = vmor %vm499_vm10, %vm500_vm9 }
 0x5e2   :  { %v496_v20 = vsub.f32 1.0, %v495_v16  ;;  %v493_v13 = vmul.f32 %v492_v25, %v451_v26 }
 0x5e4   :  { %v497_v23 = vmul.f32 %v769_v12, %v496_v20  ;;  %v510_v42 = vadd.f32 %v509_v34, %v493_v13 }
 0x5e6   :  { %v498_v28 = vadd.f32 %v769_v12, %v497_v23 }
 0x5e8   :  { %v502_v33 = vsel %vm501_vm11, %v769_v12, %v498_v28 }
 0x5e9   :  { %v507_v37 = vsel %vm504_vm12, %v506_v31, %v502_v33 }
 0x5ea   :  { %v508_v0 = vmul.f32 %v507_v37, %v452_v30 }
 0x5ec   :  { %v511_v45 = vadd.f32 %v509_v34, %v508_v0 }
 0x5ee   :  { %v512_v2 = vpack.c.bf16 %v511_v45, %v510_v42 }
 0x5f0   :  { %688 = vmatmul.msk.bf16.vlgmr.msrb.gmra.mxu0 %vm52_vm0, %v512_v2 }
 0x66d   :  { %v542_v47 = vpop.f32.mrf.mxu0 }
 0x66e   :  { %v543_v49 = vadd.f32 %v542_v47, %v517_v48 }
 0x670   :  { %v547_v35 = vmax.f32 %v543_v49, 0.0 }
 0x675   :  { %v544_v10 = vpop.f32.mrf.mxu0 }
 0x676   :  { %v545_v18 = vadd.f32 %v544_v10, %v517_v48 }
 0x678   :  { %v548_v52 = vmax.f32 %v545_v18, 0.0 }
 0x67a   :  { %v549_v54 = vpack.c.bf16 %v548_v52, %v547_v35 }
 0x67c   :  { %705 = vmatmul.msk.bf16.vlgmr.msrb.gmra.mxu3 %vm306_vm15, %v549_v54 }
 0x6ff   :  { %v595_v56 = vpop.f32.mrf.mxu3 }
 0x700   :  { %v596_v39 = vadd.f32 %v595_v56, %v558_v55 }
 0x702   :  { %v600_v43 = vadd.f32 %v596_v39, %v1040_v29 }
 0x704   :  { %616 = vrot.lane.b32.xlu2 %v600_v43, %s773_s7  ;;  %604 = vrot.lane.b32.xlu0 %v600_v43, %s772_s23 }
 0x707   :  { %v597_v61 = vpop.f32.mrf.mxu3 }
 0x708   :  { %v598_v62 = vadd.f32 %v597_v61, %v558_v55 }
 0x70a   :  { %v601_v36 = vadd.f32 %v598_v62, %v1045_v32 }
 0x70c   :  { %612 = vrot.lane.b32.xlu1 %v601_v36, %s774_s0  ;;  %606 = vrot.lane.b32.xlu0 %v601_v36, %s772_s23 }
 0x714   :  { %610 = vrot.lane.b32.xlu1 %v600_v43, %s774_s0  ;;  %618 = vrot.lane.b32.xlu0 %v601_v36, %s773_s7 }
 0x75e   :  { %v617_v27 = vpop.permute.xlu2 %616 }
 0x776   :  { %v605_v6 = vpop.permute.xlu0 %604 }
 0x777   :  { %v622_v32 = vsel %vm52_vm0, %v600_v43, %v605_v6 }
 0x77e   :  { %v613_v63 = vpop.permute.xlu1 %612  ;;  %v607_v40 = vpop.permute.xlu0 %606 }
 0x77f   :  { %v623_v29 = vsel %vm52_vm0, %v601_v36, %v607_v40  ;;  %vm631_vm0 = vcmask 130048  }
 0x780   :  { %v625_v1 = vsel %vm306_vm15, %v623_v29, %v613_v63 }
 0x786   :  { %v611_v60 = vpop.permute.xlu1 %610  ;;  %v619_v50 = vpop.permute.xlu0 %618 }
 0x787   :  { %v624_v3 = vsel %vm306_vm15, %v622_v32, %v611_v60  ;;  %v628_v4 = vsel %vm626_vm13, %v625_v1, %v619_v50 }
 0x788   :  { %v630_v5 = vmul.f32 %v628_v4, %v49_v58  ;;  %v627_v51 = vsel %vm626_vm13, %v624_v3, %v617_v27 }
 0x789   :  { %v629_v7 = vmul.f32 %v627_v51, %v48_v57 }
 0x78a   :  { %649 = vmatpush.msrb.mxu2 %v630_v5 }
 0x78c   :  { %650 = vmatpush.msrb.mxu2 %v629_v7 }
 0x78d   :  { %706 = vmatmul.msk.f32.vlgmr.msrb.gmra.mxu2 %vm631_vm0, %v50_v53 }
 0x810   :  { %v652_v59 = vpop.f32.mrf.mxu2 }
 0x811   :  { %655 = vst [vmem:[%s1125_s10] sm:$0x3] %v652_v59 }

</bundles_post_ra>
